<compile_context>
chip_gen: v6e
topology: v6e:2x2x1
jax: 0.10.0
libtpu: 0.0.40
codegen_flags: <defaults>
</compile_context>

<pallas_src>
import functools

import jax
import jax.numpy as jnp
from jax import lax
from jax.experimental import pallas as pl
from jax.experimental.pallas import tpu as pltpu


def hebbmask_kernel(x_ref, w_ref, b_ref, p_ref, y_ref, p_new_ref, *, lr):
    """One Out-tile of the HebbMask forward + permanence update.

    x_ref:     (B, In)       activations (whole batch, resident every grid step)
    w_ref:     (T_OUT, In)   raw weight rows for this tile
    b_ref:     (1, T_OUT)    bias slice
    p_ref:     (T_OUT, In)   permanence rows for this tile
    y_ref:     (B, T_OUT)    output slice
    p_new_ref: (T_OUT, In)   updated permanence rows (aliases permanence in HBM)
    """
    x = x_ref[...].astype(jnp.float32)        # (B, In)
    raw_w = w_ref[...].astype(jnp.float32)    # (T_OUT, In)
    perm = p_ref[...].astype(jnp.float32)     # (T_OUT, In)
    bias = b_ref[...].astype(jnp.float32)     # (1, T_OUT)

    # method(): mask the raw weight by (permanence > 0) — single vsel per vreg.
    w = jnp.where(perm > 0, raw_w, jnp.float32(0.0))

    # nn.Linear forward: y = x @ w.T + b.  Contract over In via dot_general so
    # the MXU is fed directly (no XLU transpose of the weight tile).
    y = lax.dot_general(
        x, w,
        dimension_numbers=(((1,), (1,)), ((), ())),
        preferred_element_type=jnp.float32) + bias            # (B, T_OUT)
    y_ref[...] = y.astype(y_ref.dtype)

    # _update(): Hebbian outer-product sum over batch = y.T @ x, transpose-free.
    update = lax.dot_general(
        y, x,
        dimension_numbers=(((0,), (0,)), ((), ())),
        preferred_element_type=jnp.float32)                   # (T_OUT, In)
    p_new = jnp.clip(perm + lr * update * raw_w, -1.0, 1.0)
    p_new_ref[...] = p_new.astype(p_new_ref.dtype)


def _vmem_budget_bytes():
    """VMEM budget: adapt to the chip (64 MiB/TC on v7x, 128 MiB on v5e/v6e)."""
    try:
        cap = pltpu.get_tpu_info().vmem_capacity_bytes
    except Exception:
        cap = 128 * 1024 * 1024
    # Leave headroom for compiler-internal scratch; cap at ~100 MiB on big-VMEM
    # chips.  On v7x this works out to ~48 MiB.
    return int(min(cap - 16 * 1024 * 1024, 100 * 1024 * 1024))


def _pick_tile_out(out_f, in_f, batch, itemsize, budget_bytes):
    """Largest Out-tile (multiple of 128 that divides Out) whose double-buffered
    working set fits the VMEM budget."""
    if out_f % 128 != 0:
        return out_f  # small / ragged layer: single full block over Out
    best = 128
    for cand in range(128, out_f + 1, 128):
        if out_f % cand:
            continue
        need = itemsize * (
            3 * 2 * cand * in_f      # w, perm, p_new tiles, double-buffered
            + 2 * batch * cand       # y tile, double-buffered
            + 2 * cand               # bias tile, double-buffered
            + 2 * batch * in_f)      # x (resident, double-buffered)
        if need <= budget_bytes:
            best = cand
    return best


def hebbmask_forward(x, raw_w, bias, permanence, lr=0.1, tile_out=None):
    """One HebbMask step. Returns (y, new_permanence).

    Note: permanence is aliased to the new-permanence output; callers that
    donate it (e.g. under jit) must not reuse the passed-in array afterwards.
    """
    B, In = x.shape
    Out, In2 = raw_w.shape
    assert In == In2 and bias.shape == (Out,) and permanence.shape == (Out, In)
    bias2d = bias.reshape(1, Out)

    budget = _vmem_budget_bytes()
    if tile_out is None:
        tile_out = _pick_tile_out(Out, In, B, raw_w.dtype.itemsize, budget)
    assert Out % tile_out == 0
    grid = (Out // tile_out,)

    itemsize = x.dtype.itemsize
    cost = pl.CostEstimate(
        flops=4 * B * Out * In,                                   # two (B,Out,In) matmuls
        transcendentals=0,
        bytes_accessed=itemsize * (3 * Out * In + B * In + B * Out + Out),
    )

    kernel = functools.partial(hebbmask_kernel, lr=float(lr))
    y, new_perm = pl.pallas_call(
        kernel,
        out_shape=(
            jax.ShapeDtypeStruct((B, Out), x.dtype),
            jax.ShapeDtypeStruct((Out, In), permanence.dtype),
        ),
        grid=grid,
        in_specs=[
            pl.BlockSpec((B, In), lambda i: (0, 0)),            # x (resident)
            pl.BlockSpec((tile_out, In), lambda i: (i, 0)),     # weight_raw tile
            pl.BlockSpec((1, tile_out), lambda i: (0, i)),      # bias tile
            pl.BlockSpec((tile_out, In), lambda i: (i, 0)),     # permanence tile
        ],
        out_specs=(
            pl.BlockSpec((B, tile_out), lambda i: (0, i)),      # y tile
            pl.BlockSpec((tile_out, In), lambda i: (i, 0)),     # new permanence tile
        ),
        input_output_aliases={3: 1},   # permanence updated in place (stateful buffer)
        compiler_params=pltpu.CompilerParams(
            dimension_semantics=("parallel",),   # Out tiles independent (megacore on v7x)
            vmem_limit_bytes=budget,
        ),
        cost_estimate=cost,
    )(x, raw_w, bias2d, permanence)
    return y, new_perm


def hebbmask_reference(x, raw_w, bias, permanence, lr=0.1):
    mask = (permanence > 0).astype(x.dtype)
    w = raw_w * mask
    y = jnp.dot(x, w.T, precision=lax.Precision.HIGHEST) + bias[None, :]
    update = jnp.dot(y.T, x, precision=lax.Precision.HIGHEST)
    new_perm = jnp.clip(permanence + lr * update * raw_w, -1.0, 1.0)
    return y, new_perm


if __name__ == "__main__":
    key = jax.random.PRNGKey(0)
    B, In, Out = 8, 256, 512
    lr = 0.1

    k_x, k_w, k_b = jax.random.split(key, 3)
    x = jax.random.normal(k_x, (B, In), dtype=jnp.float32)
    # nn.Linear-style init (uniform in +/- 1/sqrt(In))
    bound = 1.0 / jnp.sqrt(jnp.float32(In))
    raw_w = jax.random.uniform(k_w, (Out, In), minval=-bound, maxval=bound,
                               dtype=jnp.float32)
    bias = jax.random.uniform(k_b, (Out,), minval=-bound, maxval=bound,
                              dtype=jnp.float32)
    # HebbMask.__init__ registers permanence = ones_like(weight_raw)
    permanence = jnp.ones((Out, In), dtype=jnp.float32)

    # Step 1 (permanence all ones -> mask all ones).  tile_out=128 forces the
    # multi-tile pipelined path even at this small demo size.
    y1, perm1 = hebbmask_forward(x, raw_w, bias, permanence, lr=lr, tile_out=128)
    jax.block_until_ready((y1, perm1))
    y1_ref, perm1_ref = hebbmask_reference(x, raw_w, bias, permanence, lr=lr)
    assert jnp.allclose(y1, y1_ref, atol=1e-4, rtol=1e-4)
    assert jnp.allclose(perm1, perm1_ref, atol=1e-4, rtol=1e-4)

    # Step 2 reuses the updated permanence buffer (stateful behavior of the
    # module); tile size auto-picked from the device's VMEM capacity.
    y2, perm2 = hebbmask_forward(x, raw_w, bias, perm1, lr=lr)
    jax.block_until_ready((y2, perm2))
    y2_ref, perm2_ref = hebbmask_reference(x, raw_w, bias, perm1_ref, lr=lr)
    assert jnp.allclose(y2, y2_ref, atol=1e-4, rtol=1e-4)
    assert jnp.allclose(perm2, perm2_ref, atol=1e-4, rtol=1e-4)

    print("KERNEL_OK")
</pallas_src>

<mosaic_0001>
module attributes {stable_mosaic.version = 11 : i64} {
  func.func @hebbmask_kernel(%arg0: i32, %arg1: memref<8x256xf32, #tpu.memory_space<vmem>>, %arg2: memref<128x256xf32, #tpu.memory_space<vmem>>, %arg3: memref<1x128xf32, #tpu.memory_space<vmem>>, %arg4: memref<128x256xf32, #tpu.memory_space<vmem>>, %arg5: memref<8x128xf32, #tpu.memory_space<vmem>>, %arg6: memref<128x256xf32, #tpu.memory_space<vmem>>) attributes {dimension_semantics = [#tpu.dimension_semantics<parallel>], iteration_bounds = array<i64: 4>, scalar_prefetch = 0 : i64, scratch_operands = 0 : i64, tpu.core_type = #tpu.core_type<tc>, window_params = [{pipeline_mode = #tpu.pipeline_mode<synchronous>, transform_indices = @transform_0, window_bounds = array<i64: 8, 256>}, {transform_indices = @transform_1, window_bounds = array<i64: 128, 256>}, {transform_indices = @transform_2, window_bounds = array<i64: 1, 128>}, {transform_indices = @transform_3, window_bounds = array<i64: 128, 256>}, {transform_indices = @transform_4, window_bounds = array<i64: 8, 128>}, {transform_indices = @transform_5, window_bounds = array<i64: 128, 256>}]} {
    %c0 = arith.constant 0 : index
    %c0_0 = arith.constant 0 : index
    %0 = vector.load %arg1[%c0, %c0_0] : memref<8x256xf32, #tpu.memory_space<vmem>>, vector<8x256xf32>
    %c0_1 = arith.constant 0 : index
    %c0_2 = arith.constant 0 : index
    %1 = vector.load %arg2[%c0_1, %c0_2] : memref<128x256xf32, #tpu.memory_space<vmem>>, vector<128x256xf32>
    %c0_3 = arith.constant 0 : index
    %c0_4 = arith.constant 0 : index
    %2 = vector.load %arg4[%c0_3, %c0_4] : memref<128x256xf32, #tpu.memory_space<vmem>>, vector<128x256xf32>
    %c0_5 = arith.constant 0 : index
    %c0_6 = arith.constant 0 : index
    %3 = vector.load %arg3[%c0_5, %c0_6] : memref<1x128xf32, #tpu.memory_space<vmem>>, vector<1x128xf32>
    %cst = arith.constant 0.000000e+00 : f32
    %4 = vector.broadcast %cst : f32 to vector<128x256xf32>
    %5 = arith.cmpf ogt, %2, %4 : vector<128x256xf32>
    %cst_7 = arith.constant 0.000000e+00 : f32
    %6 = vector.broadcast %cst_7 : f32 to vector<128x256xf32>
    %7 = arith.select %5, %1, %6 : vector<128x256xi1>, vector<128x256xf32>
    %cst_8 = arith.constant dense<0.000000e+00> : vector<8x128xf32>
    %8 = tpu.matmul %0, %7, %cst_8 {dimension_numbers = #tpu.dot_dimension_numbers<[1], [1], [0], [0], [0, 0, 1, 0], [], []>} : vector<8x256xf32>, vector<128x256xf32>, vector<8x128xf32> -> vector<8x128xf32>
    %9 = vector.broadcast %3 : vector<1x128xf32> to vector<8x128xf32>
    %10 = arith.addf %8, %9 : vector<8x128xf32>
    %c0_9 = arith.constant 0 : index
    %c0_10 = arith.constant 0 : index
    %11 = vector.load %arg5[%c0_9, %c0_10] : memref<8x128xf32, #tpu.memory_space<vmem>>, vector<8x128xf32>
    tpu.vector_store %arg5[%c0_9, %c0_10], %10 {strides = array<i32>} : memref<8x128xf32, #tpu.memory_space<vmem>>, vector<8x128xf32>,
    %cst_11 = arith.constant dense<0.000000e+00> : vector<128x256xf32>
    %12 = tpu.matmul %10, %0, %cst_11 {dimension_numbers = #tpu.dot_dimension_numbers<[0], [0], [1], [1], [0, 1, 1, 1], [], []>} : vector<8x128xf32>, vector<8x256xf32>, vector<128x256xf32> -> vector<128x256xf32>
    %cst_12 = arith.constant 1.000000e-01 : f32
    %13 = vector.broadcast %cst_12 : f32 to vector<128x256xf32>
    %14 = arith.mulf %13, %12 : vector<128x256xf32>
    %15 = arith.mulf %14, %1 : vector<128x256xf32>
    %16 = arith.addf %2, %15 : vector<128x256xf32>
    %cst_13 = arith.constant -1.000000e+00 : f32
    %cst_14 = arith.constant 1.000000e+00 : f32
    %17 = vector.broadcast %cst_13 : f32 to vector<128x256xf32>
    %18 = arith.maximumf %17, %16 : vector<128x256xf32>
    %19 = vector.broadcast %cst_14 : f32 to vector<128x256xf32>
    %20 = arith.minimumf %19, %18 : vector<128x256xf32>
    %c0_15 = arith.constant 0 : index
    %c0_16 = arith.constant 0 : index
    %21 = vector.load %arg6[%c0_15, %c0_16] : memref<128x256xf32, #tpu.memory_space<vmem>>, vector<128x256xf32>
    tpu.vector_store %arg6[%c0_15, %c0_16], %20 {strides = array<i32>} : memref<128x256xf32, #tpu.memory_space<vmem>>, vector<128x256xf32>,
    return
  }
  func.func @transform_0(%arg0: i32) -> (i32, i32) {
    %c0_i32 = arith.constant 0 : i32
    %c0_i32_0 = arith.constant 0 : i32
    %c0_i32_1 = arith.constant 0 : i32
    return %c0_i32, %c0_i32_0 : i32, i32
  }
  func.func @transform_1(%arg0: i32) -> (i32, i32) {
    %c0_i32 = arith.constant 0 : i32
    %c0_i32_0 = arith.constant 0 : i32
    return %arg0, %c0_i32 : i32, i32
  }
  func.func @transform_2(%arg0: i32) -> (i32, i32) {
    %c0_i32 = arith.constant 0 : i32
    %c0_i32_0 = arith.constant 0 : i32
    return %c0_i32, %arg0 : i32, i32
  }
  func.func @transform_3(%arg0: i32) -> (i32, i32) {
    %c0_i32 = arith.constant 0 : i32
    %c0_i32_0 = arith.constant 0 : i32
    return %arg0, %c0_i32 : i32, i32
  }
  func.func @transform_4(%arg0: i32) -> (i32, i32) {
    %c0_i32 = arith.constant 0 : i32
    %c0_i32_0 = arith.constant 0 : i32
    return %c0_i32, %arg0 : i32, i32
  }
  func.func @transform_5(%arg0: i32) -> (i32, i32) {
    %c0_i32 = arith.constant 0 : i32
    %c0_i32_0 = arith.constant 0 : i32
    return %arg0, %c0_i32 : i32, i32
  }
}

</mosaic_0001>

<bundles_post_ra>
// kernel: tpu_custom_call.1
= control target key start
LH: loop header
LB: loop body
LE: loop exit
PB: predicated region body
PF: predicated region fallthrough
CT: control target
= control target key end

     0   :  { %11 = vsyncpa [#allocation3], 0  ;;  %s1995_s0 = inlined_call_operand.vmem [shape: f32[8,256], index: 0, kind: input, shape index: {}]   ;;  %s1996_s1 = inlined_call_operand.vmem [shape: f32[512,256], index: 1, kind: input, shape index: {}]   ;;  %s1997_s2 = inlined_call_operand.vmem [shape: f32[1,512], index: 2, kind: input, shape index: {}]   ;;  %s1998_s3 = inlined_call_operand.hbm [shape: f32[512,256], index: 3, kind: input, shape index: {}, may-alias: {3,5}]   ;;  %s1999_s4 = inlined_call_operand.hbm [shape: f32[8,512], index: 4, kind: output, shape index: {0}]   ;;  %s2000_s5 = inlined_call_operand.hbm [shape: f32[512,256], index: 5, kind: output, shape index: {1}, may-alias: {3,5}]  }
   0x1   :  { %13 = vsyncpa [#allocation3 + $0x1], 0 }
   0x2   :  { %14 = vsyncpa [#allocation4], 0 }
   0x3   :  { %16 = vsyncpa [#allocation4 + $0x1], 0 }
   0x4   :  { %17 = vsyncpa [#allocation7], 0 }
   0x5   :  { %19 = vsyncpa [#allocation7 + $0x1], 0  ;;  %s1423_s18 = smov 0   ;;  %s1425_s19 = smov 0  }
   0x6   :  { %s1427_s20 = smov 0   ;;  %s1429_s21 = smov 0  }
   0x7 LB: > { %s1444_s22 = sadd.s32 4294967295, %s1383_s21   ;;  %s1097_s23 = sadd.s32 4294967294, %s1383_s21   ;;  %s1383_s21 = sphi %s1429_s21, %s2059_s21   ;;  %s1379_s20 = sphi %s1427_s20, %s2058_s20   ;;  %s1375_s19 = sphi %s1425_s19, %s2057_s19   ;;  %s1371_s18 = sphi %s1423_s18, %s2056_s18  }
   0x8   : > { %s1448_s24 = sadd.s32 1, %s1383_s21   ;;  %s105_s25 = sadd.s32 1, %s1379_s20 }
   0x9   : > { %s102_s26 = ssub.s32 %s1383_s21, %s1448_s24  ;;  %p112_p0 = scmp.ne.s32.totalorder %s1379_s20, %s1375_s19 }
   0xa   : > { %p103_p1 = scmp.eq.s32.totalorder %s102_s26, 0  ;;  %p113_p2 = scmp.eq.s32.totalorder %s1383_s21, 0 }
   0xb   : > { %p118_p3 = scmp.ne.s32.totalorder %s1375_s19, %s1371_s18  ;;  %p119_p4 = scmp.eq.s32.totalorder %s1444_s22, 0 }
   0xc   : > { %s1460_s27 = scalar_select %p103_p1, %s1379_s20, %s105_s25  }
   0xd   : > { %p1462_p5 = por %p113_p2, %p112_p0  ;;  %p1466_p6 = por %p119_p4, %p118_p3 }
   0xe   : > { %p142_p7 = scmp.eq.s32.totalorder %s1444_s22, 3  ;;  %p148_p8 = scmp.eq.s32.totalorder %s1097_s23, 3 }
   0xf   : > { %s2019_s29 = scalar_select %p1466_p6, 1, 0 }
  0x10   : > { %p1222_p9 = scmp.lt.s32.totalorder %s1383_s21, 4  ;;  %p1472_p10 = por %p142_p7, %p112_p0 }
  0x11   : > { %p1476_p11 = por %p148_p8, %p118_p3  ;;  %s213_s7 = sand.u32 1, %s1379_s20  }
  0x12   : > { %s2020_s30 = scalar_select %p1472_p10, 1, 0 }
  0x13   : > { %s2021_s6 = scalar_select %p1476_p11, 1, 0 }
  0x14   : > { %s1201_s8 = sshll.u32 %s1383_s21, 12  ;;  %s1100_s9 = sshll.u32 %s213_s7, 8 }
  0x15   : > { %s1485_s12 = scalar_lea.hbm %s1998_s3, %s1201_s8  ;;  %s217_s13 = scalar_lea.vmem [#allocation2], %s1100_s9 }
  0x16   : > { %s225_s14 = sshll.u32 %s217_s13, 4  ;;  %p1489_p12 = pnand %p1222_p9, %p1462_p5  ;;  %s1493_s14 = int_to_ptr.vmem [resolvable:$true] %s225_s14 }
  0x17   : > { %s1495_s16 = scalar_lea.sflag [#allocation3], %s213_s7  ;;  %s1261_s17 = scalar_lea.hbm %s1485_s12, 4096 }
  0x18   : > { %p1262_p13 = scmp.ne.s32.totalorder %s1485_s12, %s1261_s17  ;;  %p1263_p0 = pneg %p1489_p12 }
  0x19   : > { %s1266_s26 = scalar_lea.hbm %s1998_s3, 16384  ;;  %p1267_p3 = scmp.lt.s32.totalorder %s1485_s12, %s1998_s3 }
  0x1a   : > { %p1264_p1 = pnand %p1263_p0, %p1262_p13  ;;  %p1268_p4 = scmp.lt.s32.totalorder %s1266_s26, %s1261_s17 }
  0x1c   : > { %p1265_p2 = pneg %p1264_p1  ;;  %p1269_p5 = por %p1268_p4, %p1267_p3 }
  0x1e   : > { %p1270_p7 = pnand %p1269_p5, %p1265_p2 }
  0x20   : > { %1273 = shalt.err (!%p1270_p7)
}
  0x21   : > { %s1274_s7 = scalar_lea.vmem %s1493_s14, 4096  ;;  %s1385_s9 = smov [#allocation2]  }
  0x22   : > { %p1275_p8 = scmp.ne.s32.totalorder %s1493_s14, %s1274_s7  ;;  %s1279_s10 = sshll.u32 %s1385_s9, 4  ;;  %s1280_s10 = int_to_ptr.vmem [resolvable:$false] %s1279_s10 }
  0x23   : > { %s1281_s11 = scalar_lea.vmem %s1280_s10, 8192  ;;  %p1282_p1 = scmp.lt.s32.totalorder %s1493_s14, %s1280_s10 }
  0x24   : > { %p1277_p9 = pnand %p1275_p8, %p1263_p0  ;;  %p1283_p11 = scmp.lt.s32.totalorder %s1281_s11, %s1274_s7 }
  0x26   : > { %p1278_p13 = pneg %p1277_p9  ;;  %p1284_p10 = por %p1283_p11, %p1282_p1 }
  0x28   : > { %p1285_p6 = pnand %p1284_p10, %p1278_p13 }
  0x2a   : > { %1288 = shalt.err (!%p1285_p6)
}
  0x2b   : > { %s1386_s13 = smov 256   ;;  %s1387_s17 = smov 16  }
  0x2c   : > { %1214 = dma.hbm_to_vmem [thread:$0]  (!%p1489_p12), %s1485_s12, 4096, %s1493_s14, %s1495_s16, %s1386_s13, %s1386_s13, %s1387_s17  }
  0x2d   : > { %p1104_p0 = scmp.ge.s32.totalorder %s1383_s21, 1  ;;  %p233_p2 = scmp.lt.s32.totalorder %s1383_s21, 5 }
  0x2f   : > { %p234_p3 = pnand %p1104_p0, %p233_p2 }
  0x31   : > { %237 = sbr.rel (%p234_p3) target bundleno = 726 (0x2d6), region = 36 }
  0x36   : > { %s1519_s23 = sand.u32 1, %s1375_s19   ;;  %p2023_p6 = scmp.ne.s32.totalorder %s2019_s29, 0 }
  0x37   : > { %s1105_s25 = sshll.u32 %s1519_s23, 8  ;;  %s240_s26 = scalar_lea.sflag [#allocation3], %s1519_s23 }
  0x38   : > { %s1525_s28 = scalar_lea.vmem [#allocation2], %s1105_s25 }
  0x39   : > { %1358 = dma.done.wait (%p2023_p6), %s240_s26, 4096  }
  0x3a   : > { %1360 = vsyncadd (%p2023_p6), %s240_s26, 4294963200  ;;  %s1108_s12 = sshll.u32 %s1444_s22, 4  ;;  %v1541_v1 = vld [vmem:[%s1525_s28 + $0xf8] sm:$0xff]  ;;  %v1548_v3 = vld [vmem:[%s1525_s28 + $0xf0] sm:$0xff]  ;;  %p291_p11 = scmp.lt.s32.totalorder %s1444_s22, 3 }
  0x3b   : > { %p285_p10 = scmp.lt.s32.totalorder %s1108_s12, 63  ;;  %2025 = vst [vmem:[#allocation12_spill] sm:$0xff] %v1541_v1  ;;  %vm394_vm0 = vcmp.gt.f32.partialorder %v1541_v1, 0.0  ;;  %2027 = vst [vmem:[#allocation14_spill] sm:$0xff] %v1548_v3  ;;  %v1554_v5 = vld [vmem:[%s1525_s28 + $0xe8] sm:$0xff]  ;;  %vm393_vm1 = vcmp.gt.f32.partialorder %v1548_v3, 0.0 }
  0x3c   : > { %2029 = vst [vmem:[#allocation16_spill] sm:$0xff] %v1554_v5  ;;  %vm392_vm2 = vcmp.gt.f32.partialorder %v1554_v5, 0.0  ;;  %v1560_v6 = vld [vmem:[%s1525_s28 + $0xe0] sm:$0xff]  ;;  %v1564_v7 = vld [vmem:[%s1525_s28 + $0xd8] sm:$0xff]  ;;  %v1576_v10 = vld [vmem:[%s1525_s28 + $0xd0] sm:$0xff]  ;;  %s292_s11 = scalar_select %p291_p11, %s1444_s22, 3 }
  0x3d   : > { %s2061_s12 = smov (!%p285_p10, %s1108_s12), 63  ;;  %2030 = vst [vmem:[#allocation17_spill] sm:$0xff] %v1560_v6  ;;  %2031 = vst [vmem:[#allocation18_spill] sm:$0xff] %v1564_v7  ;;  %vm391_vm3 = vcmp.gt.f32.partialorder %v1560_v6, 0.0  ;;  %vm390_vm4 = vcmp.gt.f32.partialorder %v1564_v7, 0.0  ;;  %v1579_v11 = vld [vmem:[%s1525_s28 + $0xc8] sm:$0xff] }
  0x3e   : > { %s1202_s14 = sshll.u32 %s2061_s12, 4  ;;  %2034 = vst [vmem:[#allocation21_spill] sm:$0xff] %v1576_v10  ;;  %2035 = vst [vmem:[#allocation22_spill] sm:$0xff] %v1579_v11  ;;  %vm389_vm5 = vcmp.gt.f32.partialorder %v1576_v10, 0.0  ;;  %vm388_vm6 = vcmp.gt.f32.partialorder %v1579_v11, 0.0  ;;  %v1592_v14 = vld [vmem:[%s1525_s28 + $0xc0] sm:$0xff]  ;;  %s293_s26 = scalar_lea.vmem %s1997_s2, %s292_s11 }
  0x3f   : > { %s1535_s8 = scalar_lea.vmem %s1996_s1, %s1202_s14  ;;  %2038 = vst [vmem:[#allocation25_spill] sm:$0xff] %v1592_v14  ;;  %v1595_v15 = vld [vmem:[%s1525_s28 + $0xb8] sm:$0xff]  ;;  %vm387_vm7 = vcmp.gt.f32.partialorder %v1592_v14, 0.0  ;;  %v1608_v18 = vld [vmem:[%s1525_s28 + $0xb0] sm:$0xff]  ;;  %v1611_v19 = vld [vmem:[%s1525_s28 + $0xa8] sm:$0xff]  ;;  %s1194_s14 = sshll.u32 %s1444_s22, 7 }
  0x40   : > { %v1538_v0 = vld [vmem:[%s1535_s8 + $0xf8] sm:$0xff]  ;;  %v1544_v2 = vld [vmem:[%s1535_s8 + $0xf0] sm:$0xff]  ;;  %v1551_v4 = vld [vmem:[%s1535_s8 + $0xe8] sm:$0xff]  ;;  %vm386_vm8 = vcmp.gt.f32.partialorder %v1595_v15, 0.0  ;;  %vm385_vm9 = vcmp.gt.f32.partialorder %v1608_v18, 0.0  ;;  %vm384_vm10 = vcmp.gt.f32.partialorder %v1611_v19, 0.0  ;;  %s955_s29 = scalar_lea.hbm %s1999_s4, %s1194_s14 }
  0x41   : > { %2024 = vst [vmem:[#allocation11_spill] sm:$0xff] %v1538_v0  ;;  %2026 = vst [vmem:[#allocation13_spill] sm:$0xff] %v1544_v2  ;;  %1112 = vmatprep.subr.msk.mxu0 %vm394_vm0, %v1538_v0  ;;  %v1568_v8 = vld [vmem:[%s1535_s8 + $0xe0] sm:$0xff]  ;;  %v1572_v9 = vld [vmem:[%s1535_s8 + $0xd8] sm:$0xff]  ;;  %v1388_v0 = vmov 0.0   ;;  %s939_s7 = scalar_lea.sflag [#allocation4], %s1519_s23 }
  0x42   : > { %2028 = vst [vmem:[#allocation15_spill] sm:$0xff] %v1551_v4  ;;  %1113 = vmatpush1.xpose.msk.msra.mxu0 %vm393_vm1, %v1544_v2  ;;  %2032 = vst [vmem:[#allocation19_spill] sm:$0xff] %v1568_v8  ;;  %v1584_v12 = vld [vmem:[%s1535_s8 + $0xd0] sm:$0xff]  ;;  %v1588_v13 = vld [vmem:[%s1535_s8 + $0xc8] sm:$0xff]  ;;  %649 = vmatprep.mubr.f32.mxu1 %v1388_v0  ;;  %p2039_p4 = scmp.ne.s32.totalorder %s2020_s30, 0  ;;  %s1389_s10 = smov [#allocation5]  }
  0x43   : > { %1114 = vmatprep.subr.msk.mxu0 %vm392_vm2, %v1551_v4  ;;  %2033 = vst [vmem:[#allocation20_spill] sm:$0xff] %v1572_v9  ;;  %2036 = vst [vmem:[#allocation23_spill] sm:$0xff] %v1584_v12  ;;  %v1600_v16 = vld [vmem:[%s1535_s8 + $0xc0] sm:$0xff]  ;;  %v1604_v17 = vld [vmem:[%s1535_s8 + $0xb8] sm:$0xff]  ;;  %s1293_s11 = sshll.u32 %s1389_s10, 4  ;;  %s1294_s11 = int_to_ptr.vmem [resolvable:$false] %s1293_s11 }
  0x44   : > { %2037 = vst [vmem:[#allocation24_spill] sm:$0xff] %v1588_v13  ;;  %v1616_v20 = vld [vmem:[%s1535_s8 + $0xb0] sm:$0xff]  ;;  %v1620_v21 = vld [vmem:[%s1535_s8 + $0xa8] sm:$0xff]  ;;  %v1624_v22 = vld [vmem:[%s1525_s28 + $0xa0] sm:$0xff]  ;;  %s1295_s13 = scalar_lea.vmem %s1294_s11, 256 }
  0x45   : > { %v1627_v23 = vld [vmem:[%s1525_s28 + $0x98] sm:$0xff]  ;;  %v1632_v24 = vld [vmem:[%s1535_s8 + $0xa0] sm:$0xff]  ;;  %vm383_vm11 = vcmp.gt.f32.partialorder %v1624_v22, 0.0  ;;  %v1640_v26 = vld [vmem:[%s1525_s28 + $0x90] sm:$0xff] }
  0x46   : > { %1115 = vmatpush1.xpose.msk.msra.mxu0 %vm391_vm3, %v1568_v8  ;;  %v1636_v25 = vld [vmem:[%s1535_s8 + $0x98] sm:$0xff]  ;;  %vm382_vm12 = vcmp.gt.f32.partialorder %v1627_v23, 0.0  ;;  %v297_v27 = vld [vmem:[%s1995_s0 + $0x8] sm:$0xff]  ;;  %v1651_v29 = vld [vmem:[%s1995_s0] sm:$0xff]  ;;  %vm381_vm13 = vcmp.gt.f32.partialorder %v1640_v26, 0.0 }
  0x47   : > { %1116 = vmatprep.subr.msk.mxu0 %vm390_vm4, %v1572_v9  ;;  %v1646_v28 = vld [vmem:[%s1525_s28 + $0x88] sm:$0xff]  ;;  %497 = vmatprep.mubr.f32.mxu0 %v297_v27  ;;  %v1657_v30 = vld [vmem:[%s1535_s8 + $0x90] sm:$0xff]  ;;  %v1665_v32 = vld [vmem:[%s1525_s28 + $0x80] sm:$0xff] }
  0x48   : > { %615 = vmatprep.subr.mxu1 %v297_v27  ;;  %v1661_v31 = vld [vmem:[%s1535_s8 + $0x88] sm:$0xff]  ;;  %vm380_vm14 = vcmp.gt.f32.partialorder %v1646_v28, 0.0  ;;  %v1668_v33 = vld [vmem:[%s1525_s28 + $0x78] sm:$0xff]  ;;  %v1673_v34 = vld [vmem:[%s1535_s8 + $0x80] sm:$0xff]  ;;  %vm379_vm15 = vcmp.gt.f32.partialorder %v1665_v32, 0.0 }
  0x49   : > { %616 = vmatpush1.msra.mxu1 %v1651_v29  ;;  %v1677_v35 = vld [vmem:[%s1535_s8 + $0x78] sm:$0xff]  ;;  %vm378_vm0 = vcmp.gt.f32.partialorder %v1668_v33, 0.0  ;;  %v1681_v36 = vld [vmem:[%s1525_s28 + $0x70] sm:$0xff]  ;;  %v1684_v37 = vld [vmem:[%s1525_s28 + $0x68] sm:$0xff] }
  0x4a   : > { %1117 = vmatpush1.xpose.msk.msra.mxu0 %vm389_vm5, %v1584_v12  ;;  %v1689_v38 = vld [vmem:[%s1535_s8 + $0x70] sm:$0xff]  ;;  %vm377_vm1 = vcmp.gt.f32.partialorder %v1681_v36, 0.0  ;;  %v1693_v39 = vld [vmem:[%s1535_s8 + $0x68] sm:$0xff]  ;;  %vm376_vm2 = vcmp.gt.f32.partialorder %v1684_v37, 0.0  ;;  %v1697_v40 = vld [vmem:[%s1525_s28 + $0x60] sm:$0xff] }
  0x4b   : > { %1118 = vmatprep.subr.msk.mxu0 %vm388_vm6, %v1588_v13  ;;  %v1700_v41 = vld [vmem:[%s1525_s28 + $0x58] sm:$0xff]  ;;  %v1705_v42 = vld [vmem:[%s1535_s8 + $0x60] sm:$0xff]  ;;  %vm375_vm3 = vcmp.gt.f32.partialorder %v1697_v40, 0.0  ;;  %v1713_v44 = vld [vmem:[%s1525_s28 + $0x50] sm:$0xff] }
  0x4c   : > { %v1709_v43 = vld [vmem:[%s1535_s8 + $0x58] sm:$0xff]  ;;  %vm374_vm4 = vcmp.gt.f32.partialorder %v1700_v41, 0.0  ;;  %v1716_v45 = vld [vmem:[%s1525_s28 + $0x48] sm:$0xff]  ;;  %v1721_v46 = vld [vmem:[%s1535_s8 + $0x50] sm:$0xff]  ;;  %vm373_vm5 = vcmp.gt.f32.partialorder %v1713_v44, 0.0 }
  0x4d   : > { %v1725_v47 = vld [vmem:[%s1535_s8 + $0x48] sm:$0xff]  ;;  %vm372_vm6 = vcmp.gt.f32.partialorder %v1716_v45, 0.0  ;;  %v1729_v48 = vld [vmem:[%s1525_s28 + $0x40] sm:$0xff]  ;;  %v1732_v49 = vld [vmem:[%s1525_s28 + $0x38] sm:$0xff] }
  0x4e   : > { %1119 = vmatpush1.xpose.msk.msra.mxu0 %vm387_vm7, %v1600_v16  ;;  %v1737_v50 = vld [vmem:[%s1535_s8 + $0x40] sm:$0xff]  ;;  %vm371_vm7 = vcmp.gt.f32.partialorder %v1729_v48, 0.0  ;;  %v1741_v51 = vld [vmem:[%s1535_s8 + $0x38] sm:$0xff]  ;;  %v1745_v52 = vld [vmem:[%s1525_s28 + $0x30] sm:$0xff] }
  0x4f   : > { %1120 = vmatprep.subr.msk.mxu0 %vm386_vm8, %v1604_v17  ;;  %vm370_vm8 = vcmp.gt.f32.partialorder %v1732_v49, 0.0  ;;  %v1748_v53 = vld [vmem:[%s1525_s28 + $0x28] sm:$0xff]  ;;  %v1753_v54 = vld [vmem:[%s1535_s8 + $0x30] sm:$0xff]  ;;  %v1761_v56 = vld [vmem:[%s1525_s28 + $0x20] sm:$0xff] }
  0x50   : > { %v1757_v55 = vld [vmem:[%s1535_s8 + $0x28] sm:$0xff]  ;;  %v1764_v57 = vld [vmem:[%s1525_s28 + $0x18] sm:$0xff]  ;;  %v1769_v58 = vld [vmem:[%s1535_s8 + $0x20] sm:$0xff] }
  0x51   : > { %v1773_v59 = vld [vmem:[%s1535_s8 + $0x18] sm:$0xff]  ;;  %v1777_v60 = vld [vmem:[%s1525_s28 + $0x10] sm:$0xff]  ;;  %v1780_v61 = vld [vmem:[%s1525_s28 + $0x8] sm:$0xff] }
  0x52   : > { %1121 = vmatpush1.xpose.msk.msra.mxu0 %vm385_vm9, %v1616_v20  ;;  %vm369_vm9 = vcmp.gt.f32.partialorder %v1745_v52, 0.0  ;;  %v1785_v62 = vld [vmem:[%s1535_s8 + $0x10] sm:$0xff]  ;;  %v1789_v63 = vld [vmem:[%s1535_s8 + $0x8] sm:$0xff]  ;;  %v1793_v27 = vld [vmem:[%s1525_s28] sm:$0xff]  ;;  %s1106_s28 = sshll.u32 %s1519_s23, 3 }
  0x53   : > { %1122 = vmatprep.subr.msk.mxu0 %vm384_vm10, %v1620_v21  ;;  %vm368_vm10 = vcmp.gt.f32.partialorder %v1748_v53, 0.0  ;;  %v1798_v1 = vld [vmem:[%s1535_s8] sm:$0xff]  ;;  %s1809_s12 = scalar_lea.vmem [#allocation5], %s1106_s28 }
  0x54   : > { %v1111_v3 = vld [vmem:[%s293_s26] ss:$0 sm:$0xff]  ;;  %s957_s15 = sshll.u32 %s1809_s12, 4  ;;  %s958_s15 = int_to_ptr.vmem [resolvable:$true] %s957_s15 }
  0x55   : > { %s1289_s9 = scalar_lea.vmem %s958_s15, 128  ;;  %p1296_p8 = scmp.lt.s32.totalorder %s958_s15, %s1294_s11 }
  0x56   : > { %1123 = vmatpush1.xpose.msk.msra.mxu0 %vm383_vm11, %v1632_v24  ;;  %vm367_vm11 = vcmp.gt.f32.partialorder %v1761_v56, 0.0  ;;  %p1290_p12 = scmp.ne.s32.totalorder %s958_s15, %s1289_s9  ;;  %p1297_p9 = scmp.lt.s32.totalorder %s1295_s13, %s1289_s9 }
  0x57   : > { %1124 = vmatprep.subr.msk.mxu0 %vm382_vm12, %v1636_v25  ;;  %vm366_vm12 = vcmp.gt.f32.partialorder %v1764_v57, 0.0 }
  0x58   : > { %p1291_p5 = pnand %p1290_p12, %p2039_p4  ;;  %p1298_p13 = por %p1297_p9, %p1296_p8 }
  0x5a   : > { %1125 = vmatpush1.xpose.msk.msra.mxu0 %vm381_vm13, %v1657_v30  ;;  %vm365_vm13 = vcmp.gt.f32.partialorder %v1777_v60, 0.0  ;;  %p1292_p7 = pneg %p1291_p5 }
  0x5b   : > { %1126 = vmatprep.subr.msk.mxu0 %vm380_vm14, %v1661_v31  ;;  %vm364_vm14 = vcmp.gt.f32.partialorder %v1780_v61, 0.0 }
  0x5c   : > { %p1299_p1 = pnand %p1298_p13, %p1292_p7 }
  0x5e   : > { %1127 = vmatpush1.xpose.msk.msra.mxu0 %vm379_vm15, %v1673_v34  ;;  %vm363_vm15 = vcmp.gt.f32.partialorder %v1793_v27, 0.0 }
  0x5f   : > { %1128 = vmatprep.subr.msk.mxu0 %vm378_vm0, %v1677_v35  ;;  %vm536_vm0 = vcmask 64512  }
  0x62   : > { %1129 = vmatpush1.xpose.msk.msra.mxu0 %vm377_vm1, %v1689_v38 }
  0x63   : > { %1130 = vmatprep.subr.msk.mxu0 %vm376_vm2, %v1693_v39 }
  0x66   : > { %1131 = vmatpush1.xpose.msk.msra.mxu0 %vm375_vm3, %v1705_v42 }
  0x67   : > { %1132 = vmatprep.subr.msk.mxu0 %vm374_vm4, %v1709_v43 }
  0x6a   : > { %1133 = vmatpush1.xpose.msk.msra.mxu0 %vm373_vm5, %v1721_v46 }
  0x6b   : > { %1134 = vmatprep.subr.msk.mxu0 %vm372_vm6, %v1725_v47 }
  0x6e   : > { %1135 = vmatpush1.xpose.msk.msra.mxu0 %vm371_vm7, %v1737_v50 }
  0x6f   : > { %1136 = vmatprep.subr.msk.mxu0 %vm370_vm8, %v1741_v51 }
  0x72   : > { %1137 = vmatpush1.xpose.msk.msra.mxu0 %vm369_vm9, %v1753_v54 }
  0x73   : > { %1138 = vmatprep.subr.msk.mxu0 %vm368_vm10, %v1757_v55 }
  0x76   : > { %1139 = vmatpush1.xpose.msk.msra.mxu0 %vm367_vm11, %v1769_v58 }
  0x77   : > { %1140 = vmatprep.subr.msk.mxu0 %vm366_vm12, %v1773_v59 }
  0x7a   : > { %1141 = vmatpush1.xpose.msk.msra.mxu0 %vm365_vm13, %v1785_v62 }
  0x7b   : > { %1142 = vmatprep.subr.msk.mxu0 %vm364_vm14, %v1789_v63 }
  0x7e   : > { %1143 = vmatpush1.xpose.msk.msra.mxu0 %vm363_vm15, %v1798_v1 }
  0x81   : > { %498 = vmatmul.mubr.f32.vlgmr.msra.gmra.mxu0 %v1651_v29 }
 0x141   : > { %v499_v2 = vpop.f32.mrf.mxu0 }
 0x142   : > { %v500_v5 = vadd.f32 %v1111_v3, %v499_v2 }
 0x143   : > { %v501_v4 = vpop.f32.mrf.mxu0 }
 0x144   : > { %503 = vst [vmem:[%s1809_s12] sm:$0xff] %v500_v5  ;;  %504 = vxpose.xlu0.b32.start.end [1/1] (short) %v500_v5, 128 }
 0x1c0   : > { %v520_v29 = vpop.trf.xlu0 }
 0x1c1   : > { %1144 = vmatmul.mubr.msk.f32.vlgmr.msra.gmra.mxu1 %vm536_vm0, %v520_v29 }
 0x1c2   : > { %655 = vmatprep.mubr.f32.mxu1 %v1388_v0 }
 0x1c4   : > { %v521_v6 = vpop.trf.xlu0 }
 0x1c5   : > { %1145 = vmatmul.mubr.msk.f32.gmra.mxu1 %vm536_vm0, %v521_v6 }
 0x1c6   : > { %661 = vmatprep.mubr.f32.mxu1 %v1388_v0 }
 0x1c8   : > { %v522_v8 = vpop.trf.xlu0 }
 0x1c9   : > { %1146 = vmatmul.mubr.msk.f32.gmra.mxu1 %vm536_vm0, %v522_v8 }
 0x1ca   : > { %667 = vmatprep.mubr.f32.mxu1 %v1388_v0 }
 0x1cc   : > { %v523_v2 = vpop.trf.xlu0 }
 0x1cd   : > { %1147 = vmatmul.mubr.msk.f32.gmra.mxu1 %vm536_vm0, %v523_v2 }
 0x1ce   : > { %673 = vmatprep.mubr.f32.mxu1 %v1388_v0 }
 0x1d0   : > { %v524_v3 = vpop.trf.xlu0 }
 0x1d1   : > { %1148 = vmatmul.mubr.msk.f32.gmra.mxu1 %vm536_vm0, %v524_v3 }
 0x1d2   : > { %679 = vmatprep.mubr.f32.mxu1 %v1388_v0 }
 0x1d4   : > { %v525_v4 = vpop.trf.xlu0 }
 0x1d5   : > { %1149 = vmatmul.mubr.msk.f32.gmra.mxu1 %vm536_vm0, %v525_v4 }
 0x1d6   : > { %685 = vmatprep.mubr.f32.mxu1 %v1388_v0 }
 0x1d8   : > { %v526_v5 = vpop.trf.xlu0 }
 0x1d9   : > { %1150 = vmatmul.mubr.msk.f32.gmra.mxu1 %vm536_vm0, %v526_v5 }
 0x1da   : > { %691 = vmatprep.mubr.f32.mxu1 %v1388_v0 }
 0x1dc   : > { %v527_v6 = vpop.trf.xlu0 }
 0x1dd   : > { %1151 = vmatmul.mubr.msk.f32.gmra.mxu1 %vm536_vm0, %v527_v6 }
 0x1de   : > { %697 = vmatprep.mubr.f32.mxu1 %v1388_v0 }
 0x1e0   : > { %v528_v8 = vpop.trf.xlu0 }
 0x1e1   : > { %1152 = vmatmul.mubr.msk.f32.gmra.mxu1 %vm536_vm0, %v528_v8 }
 0x1e2   : > { %703 = vmatprep.mubr.f32.mxu1 %v1388_v0 }
 0x1e4   : > { %v529_v29 = vpop.trf.xlu0 }
 0x1e5   : > { %1153 = vmatmul.mubr.msk.f32.gmra.mxu1 %vm536_vm0, %v529_v29 }
 0x1e6   : > { %709 = vmatprep.mubr.f32.mxu1 %v1388_v0 }
 0x1e8   : > { %v530_v2 = vpop.trf.xlu0 }
 0x1e9   : > { %1154 = vmatmul.mubr.msk.f32.gmra.mxu1 %vm536_vm0, %v530_v2 }
 0x1ea   : > { %715 = vmatprep.mubr.f32.mxu1 %v1388_v0 }
 0x1ec   : > { %v531_v3 = vpop.trf.xlu0 }
 0x1ed   : > { %1155 = vmatmul.mubr.msk.f32.gmra.mxu1 %vm536_vm0, %v531_v3 }
 0x1ee   : > { %721 = vmatprep.mubr.f32.mxu1 %v1388_v0 }
 0x1f0   : > { %v532_v4 = vpop.trf.xlu0 }
 0x1f1   : > { %1156 = vmatmul.mubr.msk.f32.gmra.mxu1 %vm536_vm0, %v532_v4 }
 0x1f2   : > { %727 = vmatprep.mubr.f32.mxu1 %v1388_v0 }
 0x1f4   : > { %v533_v5 = vpop.trf.xlu0 }
 0x1f5   : > { %1157 = vmatmul.mubr.msk.f32.gmra.mxu1 %vm536_vm0, %v533_v5 }
 0x1f6   : > { %733 = vmatprep.mubr.f32.mxu1 %v1388_v0 }
 0x1f8   : > { %v534_v6 = vpop.trf.xlu0 }
 0x1f9   : > { %1158 = vmatmul.mubr.msk.f32.gmra.mxu1 %vm536_vm0, %v534_v6 }
 0x1fa   : > { %739 = vmatprep.mubr.f32.mxu1 %v1388_v0 }
 0x1fc   : > { %v535_v8 = vpop.trf.xlu0 }
 0x1fd   : > { %1159 = vmatmul.mubr.msk.f32.gmra.mxu1 %vm536_vm0, %v535_v8 }
 0x1fe   : > { %1302 = shalt.err (!%p1299_p1)
}
 0x1ff   : > { %s1303_s17 = scalar_lea.hbm %s955_s29, 128  ;;  %s1307_s12 = scalar_lea.hbm %s1999_s4, 512 }
 0x200   : > { %p1304_p0 = scmp.ne.s32.totalorder %s955_s29, %s1303_s17  ;;  %p1308_p6 = scmp.lt.s32.totalorder %s955_s29, %s1999_s4 }
 0x201   : > { %p1309_p10 = scmp.lt.s32.totalorder %s1307_s12, %s1303_s17 }
 0x202   : > { %p1305_p2 = pnand %p1304_p0, %p2039_p4 }
 0x203   : > { %p1310_p11 = por %p1309_p10, %p1308_p6 }
 0x204   : > { %p1306_p3 = pneg %p1305_p2 }
 0x206   : > { %p1311_p12 = pnand %p1310_p11, %p1306_p3 }
 0x208   : > { %1314 = shalt.err (!%p1311_p12)
}
 0x209   : > { %1207 = dma.vmem_to_hbm [thread:$0]  (%p2039_p4), %s958_s15, 128, %s955_s29, %s939_s7  }
 0x20a   : > { %s1853_s15 = scalar_lea.vmem [#allocation6], %s1105_s25  ;;  %s1204_s25 = sshll.u32 %s1444_s22, 12 }
 0x20b   : > { %s971_s8 = sshll.u32 %s1853_s15, 4  ;;  %s1949_s9 = scalar_lea.hbm %s2000_s5, %s1204_s25  ;;  %s1951_s8 = int_to_ptr.vmem [resolvable:$true] %s971_s8 }
 0x20c   : > { %s944_s10 = scalar_lea.sflag [#allocation7], %s1519_s23  ;;  %s1315_s22 = scalar_lea.vmem %s1951_s8, 4096 }
 0x20d   : > { %p1316_p5 = scmp.ne.s32.totalorder %s1951_s8, %s1315_s22  ;;  %s1390_s11 = smov [#allocation6]  }
 0x20e   : > { %s1319_s13 = sshll.u32 %s1390_s11, 4  ;;  %s1320_s13 = int_to_ptr.vmem [resolvable:$false] %s1319_s13 }
 0x20f   : > { %p1317_p7 = pnand %p1316_p5, %p2039_p4  ;;  %s1321_s17 = scalar_lea.vmem %s1320_s13, 8192 }
 0x210   : > { %p1322_p9 = scmp.lt.s32.totalorder %s1951_s8, %s1320_s13  ;;  %p1323_p13 = scmp.lt.s32.totalorder %s1321_s17, %s1315_s22 }
 0x211   : > { %p1318_p8 = pneg %p1317_p7 }
 0x212   : > { %p1324_p1 = por %p1323_p13, %p1322_p9 }
 0x214   : > { %p1325_p0 = pnand %p1324_p1, %p1318_p8 }
 0x281   : > { %v651_v0 = vpop.f32.mrf.mxu1 }
 0x282   : > { %v746_v29 = vmul.f32 0.1, %v651_v0 }
 0x283   : > { %v653_v2 = vpop.f32.mrf.mxu1 }
 0x284   : > { %v778_v3 = vmul.f32 %v746_v29, %v1798_v1  ;;  %v747_v4 = vmul.f32 0.1, %v653_v2 }
 0x285   : > { %v657_v5 = vpop.f32.mrf.mxu1 }
 0x286   : > { %v810_v6 = vadd.f32 %v778_v3, %v1793_v27  ;;  %v779_v8 = vmul.f32 %v747_v4, %v1789_v63  ;;  %v748_v7 = vmul.f32 0.1, %v657_v5 }
 0x287   : > { %v659_v9 = vpop.f32.mrf.mxu1 }
 0x288   : > { %v1160_v10 = vclamps-f32 %v810_v6, 1.0  ;;  %v811_v12 = vadd.f32 %v779_v8, %v1780_v61  ;;  %v780_v11 = vmul.f32 %v748_v7, %v1785_v62  ;;  %v749_v13 = vmul.f32 0.1, %v659_v9 }
 0x289   : > { %v663_v14 = vpop.f32.mrf.mxu1 }
 0x28a   : > { %906 = vst [vmem:[%s1853_s15] sm:$0xff] %v1160_v10  ;;  %v1161_v1 = vclamps-f32 %v811_v12, 1.0  ;;  %v812_v27 = vadd.f32 %v780_v11, %v1777_v60  ;;  %v781_v63 = vmul.f32 %v749_v13, %v1773_v59  ;;  %v750_v0 = vmul.f32 0.1, %v663_v14 }
 0x28b   : > { %v665_v29 = vpop.f32.mrf.mxu1 }
 0x28c   : > { %907 = vst [vmem:[%s1853_s15 + $0x8] sm:$0xff] %v1161_v1  ;;  %v1162_v61 = vclamps-f32 %v812_v27, 1.0  ;;  %v813_v7 = vadd.f32 %v781_v63, %v1764_v57  ;;  %v782_v9 = vmul.f32 %v750_v0, %v1769_v58  ;;  %v751_v62 = vmul.f32 0.1, %v665_v29 }
 0x28d   : > { %v669_v2 = vpop.f32.mrf.mxu1 }
 0x28e   : > { %908 = vst [vmem:[%s1853_s15 + $0x10] sm:$0xff] %v1162_v61  ;;  %v1163_v3 = vclamps-f32 %v813_v7, 1.0  ;;  %v814_v10 = vadd.f32 %v782_v9, %v1761_v56  ;;  %v783_v11 = vmul.f32 %v751_v62, %v1757_v55  ;;  %v752_v12 = vmul.f32 0.1, %v669_v2 }
 0x28f   : > { %v671_v13 = vpop.f32.mrf.mxu1 }
 0x290   : > { %909 = vst [vmem:[%s1853_s15 + $0x18] sm:$0xff] %v1163_v3  ;;  %v1164_v14 = vclamps-f32 %v814_v10, 1.0  ;;  %v815_v59 = vadd.f32 %v783_v11, %v1748_v53  ;;  %v784_v57 = vmul.f32 %v752_v12, %v1753_v54  ;;  %v753_v60 = vmul.f32 0.1, %v671_v13 }
 0x291   : > { %v675_v58 = vpop.f32.mrf.mxu1 }
 0x292   : > { %910 = vst [vmem:[%s1853_s15 + $0x20] sm:$0xff] %v1164_v14  ;;  %v1165_v4 = vclamps-f32 %v815_v59, 1.0  ;;  %v816_v5 = vadd.f32 %v784_v57, %v1745_v52  ;;  %v785_v56 = vmul.f32 %v753_v60, %v1741_v51  ;;  %v754_v6 = vmul.f32 0.1, %v675_v58 }
 0x293   : > { %v677_v55 = vpop.f32.mrf.mxu1 }
 0x294   : > { %911 = vst [vmem:[%s1853_s15 + $0x28] sm:$0xff] %v1165_v4  ;;  %v1166_v8 = vclamps-f32 %v816_v5, 1.0  ;;  %v817_v1 = vadd.f32 %v785_v56, %v1732_v49  ;;  %v786_v53 = vmul.f32 %v754_v6, %v1737_v50  ;;  %v755_v27 = vmul.f32 0.1, %v677_v55 }
 0x295   : > { %v681_v54 = vpop.f32.mrf.mxu1 }
 0x296   : > { %912 = vst [vmem:[%s1853_s15 + $0x30] sm:$0xff] %v1166_v8  ;;  %v1167_v63 = vclamps-f32 %v817_v1, 1.0  ;;  %v818_v0 = vadd.f32 %v786_v53, %v1729_v48  ;;  %v787_v52 = vmul.f32 %v755_v27, %v1725_v47  ;;  %v756_v29 = vmul.f32 0.1, %v681_v54 }
 0x297   : > { %v683_v51 = vpop.f32.mrf.mxu1 }
 0x298   : > { %913 = vst [vmem:[%s1853_s15 + $0x38] sm:$0xff] %v1167_v63  ;;  %v1168_v61 = vclamps-f32 %v818_v0, 1.0  ;;  %v819_v7 = vadd.f32 %v787_v52, %v1716_v45  ;;  %v788_v49 = vmul.f32 %v756_v29, %v1721_v46  ;;  %v757_v9 = vmul.f32 0.1, %v683_v51 }
 0x299   : > { %v687_v50 = vpop.f32.mrf.mxu1 }
 0x29a   : > { %914 = vst [vmem:[%s1853_s15 + $0x40] sm:$0xff] %v1168_v61  ;;  %v1169_v62 = vclamps-f32 %v819_v7, 1.0  ;;  %v820_v2 = vadd.f32 %v788_v49, %v1713_v44  ;;  %v789_v48 = vmul.f32 %v757_v9, %v1709_v43  ;;  %v758_v3 = vmul.f32 0.1, %v687_v50 }
 0x29b   : > { %v689_v47 = vpop.f32.mrf.mxu1 }
 0x29c   : > { %915 = vst [vmem:[%s1853_s15 + $0x48] sm:$0xff] %v1169_v62  ;;  %v1170_v10 = vclamps-f32 %v820_v2, 1.0  ;;  %v821_v11 = vadd.f32 %v789_v48, %v1700_v41  ;;  %v790_v45 = vmul.f32 %v758_v3, %v1705_v42  ;;  %v759_v12 = vmul.f32 0.1, %v689_v47 }
 0x29d   : > { %v693_v46 = vpop.f32.mrf.mxu1 }
 0x29e   : > { %916 = vst [vmem:[%s1853_s15 + $0x50] sm:$0xff] %v1170_v10  ;;  %v1171_v13 = vclamps-f32 %v821_v11, 1.0  ;;  %v822_v14 = vadd.f32 %v790_v45, %v1697_v40  ;;  %v791_v44 = vmul.f32 %v759_v12, %v1693_v39  ;;  %v760_v59 = vmul.f32 0.1, %v693_v46 }
 0x29f   : > { %v695_v43 = vpop.f32.mrf.mxu1 }
 0x2a0   : > { %917 = vst [vmem:[%s1853_s15 + $0x58] sm:$0xff] %v1171_v13  ;;  %v1172_v57 = vclamps-f32 %v822_v14, 1.0  ;;  %v823_v60 = vadd.f32 %v791_v44, %v1684_v37  ;;  %v792_v41 = vmul.f32 %v760_v59, %v1689_v38  ;;  %v761_v58 = vmul.f32 0.1, %v695_v43  ;;  %v2040_v14 = vld [vmem:[#allocation25_spill] sm:$0xff]  ;;  %v2041_v59 = vld [vmem:[#allocation24_spill] sm:$0xff] }
 0x2a1   : > { %v699_v42 = vpop.f32.mrf.mxu1 }
 0x2a2   : > { %918 = vst [vmem:[%s1853_s15 + $0x60] sm:$0xff] %v1172_v57  ;;  %v1173_v4 = vclamps-f32 %v823_v60, 1.0  ;;  %v824_v5 = vadd.f32 %v792_v41, %v1681_v36  ;;  %v793_v40 = vmul.f32 %v761_v58, %v1677_v35  ;;  %v762_v56 = vmul.f32 0.1, %v699_v42  ;;  %v2042_v60 = vld [vmem:[#allocation22_spill] sm:$0xff]  ;;  %v2043_v58 = vld [vmem:[#allocation23_spill] sm:$0xff] }
 0x2a3   : > { %v701_v39 = vpop.f32.mrf.mxu1 }
 0x2a4   : > { %919 = vst [vmem:[%s1853_s15 + $0x68] sm:$0xff] %v1173_v4  ;;  %v1174_v6 = vclamps-f32 %v824_v5, 1.0  ;;  %v825_v55 = vadd.f32 %v793_v40, %v1668_v33  ;;  %v794_v37 = vmul.f32 %v762_v56, %v1673_v34  ;;  %v763_v8 = vmul.f32 0.1, %v701_v39  ;;  %v2044_v5 = vld [vmem:[#allocation21_spill] sm:$0xff]  ;;  %v2045_v56 = vld [vmem:[#allocation20_spill] sm:$0xff] }
 0x2a5   : > { %v705_v38 = vpop.f32.mrf.mxu1 }
 0x2a6   : > { %920 = vst [vmem:[%s1853_s15 + $0x70] sm:$0xff] %v1174_v6  ;;  %v1175_v1 = vclamps-f32 %v825_v55, 1.0  ;;  %v826_v53 = vadd.f32 %v794_v37, %v1665_v32  ;;  %v795_v36 = vmul.f32 %v763_v8, %v1661_v31  ;;  %v764_v27 = vmul.f32 0.1, %v705_v38  ;;  %v2046_v8 = vld [vmem:[#allocation18_spill] sm:$0xff] }
 0x2a7   : > { %v707_v35 = vpop.f32.mrf.mxu1 }
 0x2a8   : > { %921 = vst [vmem:[%s1853_s15 + $0x78] sm:$0xff] %v1175_v1  ;;  %v1176_v54 = vclamps-f32 %v826_v53, 1.0  ;;  %v827_v63 = vadd.f32 %v795_v36, %v1646_v28  ;;  %v796_v33 = vmul.f32 %v764_v27, %v1657_v30  ;;  %v765_v0 = vmul.f32 0.1, %v707_v35  ;;  %v2047_v1 = vld [vmem:[#allocation19_spill] sm:$0xff] }
 0x2a9   : > { %v711_v34 = vpop.f32.mrf.mxu1 }
 0x2aa   : > { %922 = vst [vmem:[%s1853_s15 + $0x80] sm:$0xff] %v1176_v54  ;;  %v1177_v52 = vclamps-f32 %v827_v63, 1.0  ;;  %v828_v29 = vadd.f32 %v796_v33, %v1640_v26  ;;  %v797_v32 = vmul.f32 %v765_v0, %v1636_v25  ;;  %v766_v51 = vmul.f32 0.1, %v711_v34  ;;  %v2048_v54 = vld [vmem:[#allocation17_spill] sm:$0xff]  ;;  %v2049_v33 = vld [vmem:[#allocation15_spill] sm:$0xff] }
 0x2ab   : > { %v713_v31 = vpop.f32.mrf.mxu1 }
 0x2ac   : > { %923 = vst [vmem:[%s1853_s15 + $0x88] sm:$0xff] %v1177_v52  ;;  %v1178_v61 = vclamps-f32 %v828_v29, 1.0  ;;  %v829_v7 = vadd.f32 %v797_v32, %v1627_v23  ;;  %v798_v28 = vmul.f32 %v766_v51, %v1632_v24  ;;  %v767_v49 = vmul.f32 0.1, %v713_v31  ;;  %v2050_v32 = vld [vmem:[#allocation16_spill] sm:$0xff]  ;;  %v2051_v31 = vld [vmem:[#allocation13_spill] sm:$0xff] }
 0x2ad   : > { %v717_v30 = vpop.f32.mrf.mxu1 }
 0x2ae   : > { %924 = vst [vmem:[%s1853_s15 + $0x90] sm:$0xff] %v1178_v61  ;;  %v1179_v9 = vclamps-f32 %v829_v7, 1.0  ;;  %v830_v50 = vadd.f32 %v798_v28, %v1624_v22  ;;  %v799_v26 = vmul.f32 %v767_v49, %v1620_v21  ;;  %v768_v62 = vmul.f32 0.1, %v717_v30  ;;  %v2052_v49 = vld [vmem:[#allocation14_spill] sm:$0xff] }
 0x2af   : > { %v719_v25 = vpop.f32.mrf.mxu1 }
 0x2b0   : > { %925 = vst [vmem:[%s1853_s15 + $0x98] sm:$0xff] %v1179_v9  ;;  %v1180_v2 = vclamps-f32 %v830_v50, 1.0  ;;  %v831_v48 = vadd.f32 %v799_v26, %v1611_v19  ;;  %v800_v23 = vmul.f32 %v768_v62, %v1616_v20  ;;  %v769_v3 = vmul.f32 0.1, %v719_v25  ;;  %v2053_v9 = vld [vmem:[#allocation11_spill] sm:$0xff]  ;;  %v2054_v62 = vld [vmem:[#allocation12_spill] sm:$0xff] }
 0x2b1   : > { %v723_v24 = vpop.f32.mrf.mxu1 }
 0x2b2   : > { %926 = vst [vmem:[%s1853_s15 + $0xa0] sm:$0xff] %v1180_v2  ;;  %v1181_v47 = vclamps-f32 %v831_v48, 1.0  ;;  %v832_v10 = vadd.f32 %v800_v23, %v1608_v18  ;;  %v801_v22 = vmul.f32 %v769_v3, %v1604_v17  ;;  %v770_v11 = vmul.f32 0.1, %v723_v24 }
 0x2b3   : > { %v725_v21 = vpop.f32.mrf.mxu1 }
 0x2b4   : > { %927 = vst [vmem:[%s1853_s15 + $0xa8] sm:$0xff] %v1181_v47  ;;  %v1182_v45 = vclamps-f32 %v832_v10, 1.0  ;;  %v833_v12 = vadd.f32 %v801_v22, %v1595_v15  ;;  %v802_v19 = vmul.f32 %v770_v11, %v1600_v16  ;;  %v771_v46 = vmul.f32 0.1, %v725_v21 }
 0x2b5   : > { %v729_v20 = vpop.f32.mrf.mxu1 }
 0x2b6   : > { %928 = vst [vmem:[%s1853_s15 + $0xb0] sm:$0xff] %v1182_v45  ;;  %v1183_v13 = vclamps-f32 %v833_v12, 1.0  ;;  %v834_v44 = vadd.f32 %v802_v19, %v2040_v14  ;;  %v803_v18 = vmul.f32 %v771_v46, %v2041_v59  ;;  %v772_v43 = vmul.f32 0.1, %v729_v20 }
 0x2b7   : > { %v731_v17 = vpop.f32.mrf.mxu1 }
 0x2b8   : > { %929 = vst [vmem:[%s1853_s15 + $0xb8] sm:$0xff] %v1183_v13  ;;  %v1184_v57 = vclamps-f32 %v834_v44, 1.0  ;;  %v835_v41 = vadd.f32 %v803_v18, %v2042_v60  ;;  %v804_v15 = vmul.f32 %v772_v43, %v2043_v58  ;;  %v773_v42 = vmul.f32 0.1, %v731_v17 }
 0x2b9   : > { %v735_v16 = vpop.f32.mrf.mxu1 }
 0x2ba   : > { %930 = vst [vmem:[%s1853_s15 + $0xc0] sm:$0xff] %v1184_v57  ;;  %v1185_v4 = vclamps-f32 %v835_v41, 1.0  ;;  %v836_v40 = vadd.f32 %v804_v15, %v2044_v5  ;;  %v805_v39 = vmul.f32 %v773_v42, %v2045_v56  ;;  %v774_v6 = vmul.f32 0.1, %v735_v16 }
 0x2bb   : > { %v737_v55 = vpop.f32.mrf.mxu1 }
 0x2bc   : > { %931 = vst [vmem:[%s1853_s15 + $0xc8] sm:$0xff] %v1185_v4  ;;  %v1186_v37 = vclamps-f32 %v836_v40, 1.0  ;;  %v837_v38 = vadd.f32 %v805_v39, %v2046_v8  ;;  %v806_v53 = vmul.f32 %v774_v6, %v2047_v1  ;;  %v775_v36 = vmul.f32 0.1, %v737_v55 }
 0x2bd   : > { %v741_v27 = vpop.f32.mrf.mxu1 }
 0x2be   : > { %932 = vst [vmem:[%s1853_s15 + $0xd0] sm:$0xff] %v1186_v37  ;;  %v1187_v35 = vclamps-f32 %v837_v38, 1.0  ;;  %v838_v63 = vadd.f32 %v806_v53, %v2048_v54  ;;  %v807_v0 = vmul.f32 %v775_v36, %v2049_v33  ;;  %v776_v34 = vmul.f32 0.1, %v741_v27 }
 0x2bf   : > { %v743_v52 = vpop.f32.mrf.mxu1 }
 0x2c0   : > { %933 = vst [vmem:[%s1853_s15 + $0xd8] sm:$0xff] %v1187_v35  ;;  %v1188_v29 = vclamps-f32 %v838_v63, 1.0  ;;  %v839_v51 = vadd.f32 %v807_v0, %v2050_v32  ;;  %v808_v61 = vmul.f32 %v776_v34, %v2051_v31  ;;  %v777_v7 = vmul.f32 0.1, %v743_v52 }
 0x2c2   : > { %934 = vst [vmem:[%s1853_s15 + $0xe0] sm:$0xff] %v1188_v29  ;;  %v1189_v28 = vclamps-f32 %v839_v51, 1.0  ;;  %v840_v30 = vadd.f32 %v808_v61, %v2052_v49  ;;  %v809_v50 = vmul.f32 %v777_v7, %v2053_v9 }
 0x2c4   : > { %935 = vst [vmem:[%s1853_s15 + $0xe8] sm:$0xff] %v1189_v28  ;;  %v1190_v26 = vclamps-f32 %v840_v30, 1.0  ;;  %v841_v25 = vadd.f32 %v809_v50, %v2054_v62 }
 0x2c6   : > { %936 = vst [vmem:[%s1853_s15 + $0xf0] sm:$0xff] %v1190_v26  ;;  %v1191_v2 = vclamps-f32 %v841_v25, 1.0 }
 0x2c8   : > { %937 = vst [vmem:[%s1853_s15 + $0xf8] sm:$0xff] %v1191_v2 }
 0x2c9   : > { %1328 = shalt.err (!%p1325_p0)
}
 0x2ca   : > { %s1329_s26 = scalar_lea.hbm %s1949_s9, 4096  ;;  %s1333_s14 = scalar_lea.hbm %s2000_s5, 16384 }
 0x2cb   : > { %p1330_p2 = scmp.ne.s32.totalorder %s1949_s9, %s1329_s26  ;;  %p1334_p10 = scmp.lt.s32.totalorder %s1949_s9, %s2000_s5 }
 0x2cc   : > { %p1335_p11 = scmp.lt.s32.totalorder %s1333_s14, %s1329_s26 }
 0x2cd   : > { %p1331_p3 = pnand %p1330_p2, %p2039_p4 }
 0x2ce   : > { %p1336_p12 = por %p1335_p11, %p1334_p10 }
 0x2cf   : > { %p1332_p6 = pneg %p1331_p3 }
 0x2d1   : > { %p1337_p5 = pnand %p1336_p12, %p1332_p6 }
 0x2d3   : > { %1340 = shalt.err (!%p1337_p5)
}
 0x2d4   : > { %s1391_s25 = smov 256   ;;  %s1392_s29 = smov 16  }
 0x2d5   : > { %1208 = dma.vmem_to_hbm [thread:$0]  (%p2039_p4), %s1951_s8, 4096, %s1949_s9, %s944_s10, %s1391_s25, %s1391_s25, %s1392_s29  }
 0x2d6 PF: > { %p1223_p7 = scmp.ge.s32.totalorder %s1383_s21, 2  ;;  %s986_s7 = sand.u32 1, %s1371_s18  }
 0x2d7   : > { %p2055_p8 = scmp.ne.s32.totalorder %s2021_s6, 0  ;;  %s987_s22 = scalar_lea.sflag [#allocation4], %s986_s7 }
 0x2d9   : > { %p1216_p9 = pnand %p1223_p7, %p2055_p8 }
 0x2db   : > { %p1217_p13 = pneg %p1216_p9 }
 0x2dd   : > { %1362 = dma.done.wait (%p1217_p13), %s987_s22, 128  }
 0x2de   : > { %1364 = vsyncadd (%p1217_p13), %s987_s22, 4294967168  ;;  %s996_s11 = scalar_lea.sflag [#allocation7], %s986_s7 }
 0x2df   : > { %1366 = dma.done.wait (%p1217_p13), %s996_s11, 4096  }
 0x2e0   : > { %1368 = vsyncadd (%p1217_p13), %s996_s11, 4294963200  ;;  %p22_p4 = scmp.ge.s32.totalorder %s1448_s24, 6   ;;  %s2056_s18 = smov %s1375_s19 }
 0x2e1   : > { %s2057_s19 = smov %s1379_s20  ;;  %s2058_s20 = smov %s1460_s27 }
 0x2e2   : > { %s2059_s21 = smov %s1448_s24  ;;  %24 = sbr.rel (!%p22_p4) target bundleno = 7 (0x7), region = 104 }
 0x2e7   :  { %1001 = vsyncpa [#allocation3], 1 }
 0x2e8   :  { %1003 = vsyncpa [#allocation3 + $0x1], 1 }
 0x2e9   :  { %1004 = vsyncpa [#allocation4], 1 }
 0x2ea   :  { %1006 = vsyncpa [#allocation4 + $0x1], 1 }
 0x2eb   :  { %1007 = vsyncpa [#allocation7], 1 }
 0x2ec   :  { %1009 = vsyncpa [#allocation7 + $0x1], 1 }

</bundles_post_ra>
